<compile_context>
chip_gen: v7x
topology: tpu7x:2x2x1
jax: 0.10.0
libtpu: 0.0.40
codegen_flags: <defaults>
</compile_context>

<pallas_src>
import jax
import jax.numpy as jnp
from jax.experimental import pallas as pl
from jax.experimental.pallas import tpu as pltpu


def _make_mlp_kernel(tile_b):
    # Lane-chunk the batch tile so intermediates ((32,chunk)/(16,chunk) f32) fit in vregs.
    chunk = 512 if (tile_b % 512 == 0) else tile_b
    n_chunks = tile_b // chunk

    def kernel(x_ref, w1_ref, b1_ref, w2_ref, b2_ref, w3_ref, b3_ref, o_ref):
        # x_ref: (tile_b, IN) f32 natural layout; o_ref: (1, tile_b) f32 lane-dense.
        w1 = w1_ref[...]   # (32, IN) bf16
        b1 = b1_ref[...]   # (32, 1)  f32
        w2 = w2_ref[...]   # (16, 32) bf16
        b2 = b2_ref[...]   # (16, 1)  f32
        w3 = w3_ref[...]   # (16, 1)  f32
        b3 = b3_ref[...]   # (1, 1)   f32

        def body(c, carry):
            off = pl.multiple_of(c * chunk, chunk)
            # Cast to bf16 in-kernel (x stays f32 in HBM; no extra wrapper pass).
            xc = x_ref[pl.ds(off, chunk), :].astype(jnp.bfloat16)       # (chunk, IN)

            # Layer 1: contract feature dim of both operands -> (32, chunk),
            # batch stays on the lane axis; f32 MXU accumulation.
            h1 = jax.lax.dot_general(
                w1, xc, dimension_numbers=(((1,), (1,)), ((), ())),
                preferred_element_type=jnp.float32)
            h1 = jnp.maximum(h1 + b1, 0.0)

            # Layer 2: (16, 32) @ (32, chunk) -> (16, chunk).
            h2 = jnp.dot(w2, h1.astype(jnp.bfloat16),
                         preferred_element_type=jnp.float32)
            h2 = jnp.maximum(h2 + b2, 0.0)

            # Layer 3 (out_features == 1): sublane reduction on VPU/XLU, skip the MXU.
            h3 = jnp.sum(h2 * w3, axis=0, keepdims=True) + b3           # (1, chunk)

            # Sigmoid as a single exact EUP op.
            o_ref[:, pl.ds(off, chunk)] = (0.5 * jnp.tanh(0.5 * h3) + 0.5
                                           ).astype(o_ref.dtype)
            return carry

        jax.lax.fori_loop(0, n_chunks, body, 0, unroll=True)

    return kernel


def _pick_tile_b(B, in_features, requested):
    if requested is not None:
        assert requested % 128 == 0 or requested == B, \
            "tile_b must be lane-aligned (multiple of 128) or equal to B"
        return requested
    if B <= 128:
        return B  # single full block (shapes equal to full array dims are always legal)
    # ~ceil(B/2) rounded up to 128 lanes -> at least 2 tiles so v7x's 2 TCs both work.
    tb = max(128, min(8192, ((B + 255) // 256) * 128))
    # Cap so the double-buffered x tile stays ~8 MiB (safe within scoped VMEM on v5e/v6e/v7x).
    max_tb = max(128, ((8 << 20) // (2 * 4 * in_features)) // 128 * 128)
    return min(tb, max_tb)


def feedforward_nn(x, params, *, tile_b=None):
    """x: (B, input_size) float32. params: PyTorch-layout weights (out, in), biases (out,)."""
    B, in_features = x.shape
    tile_b = _pick_tile_b(B, in_features, tile_b)
    num_tiles = pl.cdiv(B, tile_b)

    # Kernel-layout parameters (weights bf16 for the MXU; biases / last layer f32).
    w1 = params["w1"].astype(jnp.bfloat16)                       # (32, in)
    w2 = params["w2"].astype(jnp.bfloat16)                       # (16, 32)
    b1 = params["b1"].astype(jnp.float32).reshape(-1, 1)         # (32, 1)
    b2 = params["b2"].astype(jnp.float32).reshape(-1, 1)         # (16, 1)
    w3 = params["w3"].astype(jnp.float32).reshape(1, -1).T       # (16, 1)
    b3 = params["b3"].astype(jnp.float32).reshape(1, 1)          # (1, 1)

    full = lambda a: pl.BlockSpec(a.shape, lambda i: (0,) * a.ndim)

    out = pl.pallas_call(
        _make_mlp_kernel(tile_b),
        out_shape=jax.ShapeDtypeStruct((1, B), jnp.float32),
        grid_spec=pltpu.PrefetchScalarGridSpec(
            num_scalar_prefetch=0,
            grid=(num_tiles,),
            in_specs=[
                # x in natural (B, in) layout: no pad, no transpose, no cast in the wrapper.
                pl.BlockSpec((tile_b, in_features), lambda i: (i, 0)),
                full(w1), full(b1), full(w2), full(b2), full(w3), full(b3),
            ],
            out_specs=pl.BlockSpec((1, tile_b), lambda i: (0, i)),   # lane-dense output
        ),
        compiler_params=pltpu.CompilerParams(
            dimension_semantics=("parallel",),        # shard batch tiles across TCs (v7x)
            vmem_limit_bytes=32 * 1024 * 1024,
        ),
    )(x.astype(jnp.float32), w1, b1, w2, b2, w3, b3)

    # (1, B) lane-dense slab -> (B, 1) column (ragged last block's OOB lanes never land in out).
    return out[0, :B].reshape(B, 1)


def init_params(key, input_size):
    """PyTorch-default init; weights stored PyTorch-style as (out_features, in_features)."""
    k1, k2, k3 = jax.random.split(key, 3)

    def linear(k, fan_in, fan_out):
        bound = 1.0 / (fan_in ** 0.5)
        kw, kb = jax.random.split(k)
        w = jax.random.uniform(kw, (fan_out, fan_in), jnp.float32, -bound, bound)
        b = jax.random.uniform(kb, (fan_out,), jnp.float32, -bound, bound)
        return w, b

    w1, b1 = linear(k1, input_size, 32)
    w2, b2 = linear(k2, 32, 16)
    w3, b3 = linear(k3, 16, 1)
    return {"w1": w1, "b1": b1, "w2": w2, "b2": b2, "w3": w3, "b3": b3}


def reference(x, p):
    h = jnp.maximum(x @ p["w1"].T + p["b1"], 0.0)
    h = jnp.maximum(h @ p["w2"].T + p["b2"], 0.0)
    return jax.nn.sigmoid(h @ p["w3"].T + p["b3"])


if __name__ == "__main__":
    key = jax.random.PRNGKey(0)
    kx, kp = jax.random.split(key)

    input_size = 16
    params = init_params(kp, input_size)

    # Case 1: ragged batch, auto tile (-> tile_b=256, 2 grid tiles, masked last block).
    x1 = jax.random.normal(kx, (300, input_size), jnp.float32)
    out1 = jax.block_until_ready(feedforward_nn(x1, params))
    ref1 = reference(x1, params)
    assert out1.shape == (300, 1), out1.shape
    assert jnp.allclose(out1, ref1, atol=2e-2, rtol=2e-2)

    # Case 2: single big tile with in-kernel 512-lane chunking (tile_b=1024 -> 2 chunks).
    x2 = jax.random.normal(kx, (1024, input_size), jnp.float32)
    out2 = jax.block_until_ready(feedforward_nn(x2, params, tile_b=1024))
    ref2 = reference(x2, params)
    assert out2.shape == (1024, 1), out2.shape
    assert jnp.allclose(out2, ref2, atol=2e-2, rtol=2e-2)

    print("KERNEL_OK")
</pallas_src>

<mosaic_0001>
module attributes {stable_mosaic.version = 11 : i64} {
  func.func @kernel(%arg0: i32, %arg1: memref<256x16xf32, #tpu.memory_space<vmem>>, %arg2: memref<32x16xbf16, #tpu.memory_space<vmem>>, %arg3: memref<32x1xf32, #tpu.memory_space<vmem>>, %arg4: memref<16x32xbf16, #tpu.memory_space<vmem>>, %arg5: memref<16x1xf32, #tpu.memory_space<vmem>>, %arg6: memref<16x1xf32, #tpu.memory_space<vmem>>, %arg7: memref<1x1xf32, #tpu.memory_space<vmem>>, %arg8: memref<1x256xf32, #tpu.memory_space<vmem>>) attributes {dimension_semantics = [#tpu.dimension_semantics<parallel>], iteration_bounds = array<i64: 2>, scalar_prefetch = 0 : i64, scratch_operands = 0 : i64, tpu.core_type = #tpu.core_type<tc>, window_params = [{transform_indices = @transform_0, window_bounds = array<i64: 256, 16>}, {pipeline_mode = #tpu.pipeline_mode<synchronous>, transform_indices = @transform_1, window_bounds = array<i64: 32, 16>}, {pipeline_mode = #tpu.pipeline_mode<synchronous>, transform_indices = @transform_2, window_bounds = array<i64: 32, 1>}, {pipeline_mode = #tpu.pipeline_mode<synchronous>, transform_indices = @transform_3, window_bounds = array<i64: 16, 32>}, {pipeline_mode = #tpu.pipeline_mode<synchronous>, transform_indices = @transform_4, window_bounds = array<i64: 16, 1>}, {pipeline_mode = #tpu.pipeline_mode<synchronous>, transform_indices = @transform_5, window_bounds = array<i64: 16, 1>}, {pipeline_mode = #tpu.pipeline_mode<synchronous>, transform_indices = @transform_6, window_bounds = array<i64: 1, 1>}, {transform_indices = @transform_7, window_bounds = array<i64: 1, 256>}]} {
    %c0 = arith.constant 0 : index
    %c0_0 = arith.constant 0 : index
    %0 = vector.load %arg2[%c0, %c0_0] : memref<32x16xbf16, #tpu.memory_space<vmem>>, vector<32x16xbf16>
    %c0_1 = arith.constant 0 : index
    %c0_2 = arith.constant 0 : index
    %1 = vector.load %arg3[%c0_1, %c0_2] : memref<32x1xf32, #tpu.memory_space<vmem>>, vector<32x1xf32>
    %c0_3 = arith.constant 0 : index
    %c0_4 = arith.constant 0 : index
    %2 = vector.load %arg4[%c0_3, %c0_4] : memref<16x32xbf16, #tpu.memory_space<vmem>>, vector<16x32xbf16>
    %c0_5 = arith.constant 0 : index
    %c0_6 = arith.constant 0 : index
    %3 = vector.load %arg5[%c0_5, %c0_6] : memref<16x1xf32, #tpu.memory_space<vmem>>, vector<16x1xf32>
    %c0_7 = arith.constant 0 : index
    %c0_8 = arith.constant 0 : index
    %4 = vector.load %arg6[%c0_7, %c0_8] : memref<16x1xf32, #tpu.memory_space<vmem>>, vector<16x1xf32>
    %c0_9 = arith.constant 0 : index
    %c0_10 = arith.constant 0 : index
    %5 = vector.load %arg7[%c0_9, %c0_10] : memref<1x1xf32, #tpu.memory_space<vmem>>, vector<1x1xf32>
    %c0_i32 = arith.constant 0 : i32
    %c256_i32 = arith.constant 256 : i32
    %6 = arith.muli %c0_i32, %c256_i32 : i32
    %7 = tpu.assume_multiple %6, 256 : i32
    %8 = arith.index_cast %7 : i32 to index
    %c0_11 = arith.constant 0 : index
    %9 = vector.load %arg1[%8, %c0_11] : memref<256x16xf32, #tpu.memory_space<vmem>>, vector<256x16xf32>
    %10 = arith.truncf %9 : vector<256x16xf32> to vector<256x16xbf16>
    %cst = arith.constant dense<0.000000e+00> : vector<32x256xf32>
    %11 = tpu.matmul %0, %10, %cst {dimension_numbers = #tpu.dot_dimension_numbers<[1], [1], [0], [0], [0, 0, 1, 0], [], []>} : vector<32x16xbf16>, vector<256x16xbf16>, vector<32x256xf32> -> vector<32x256xf32>
    %12 = vector.broadcast %1 : vector<32x1xf32> to vector<32x256xf32>
    %13 = arith.addf %11, %12 : vector<32x256xf32>
    %cst_12 = arith.constant 0.000000e+00 : f32
    %14 = vector.broadcast %cst_12 : f32 to vector<32x256xf32>
    %15 = arith.maximumf %13, %14 : vector<32x256xf32>
    %16 = arith.truncf %15 : vector<32x256xf32> to vector<32x256xbf16>
    %cst_13 = arith.constant dense<0.000000e+00> : vector<16x256xf32>
    %17 = tpu.matmul %2, %16, %cst_13 {dimension_numbers = #tpu.dot_dimension_numbers<[1], [0], [0], [1], [0, 0, 1, 1], [], []>} : vector<16x32xbf16>, vector<32x256xbf16>, vector<16x256xf32> -> vector<16x256xf32>
    %18 = vector.broadcast %3 : vector<16x1xf32> to vector<16x256xf32>
    %19 = arith.addf %17, %18 : vector<16x256xf32>
    %cst_14 = arith.constant 0.000000e+00 : f32
    %20 = vector.broadcast %cst_14 : f32 to vector<16x256xf32>
    %21 = arith.maximumf %19, %20 : vector<16x256xf32>
    %22 = vector.broadcast %4 : vector<16x1xf32> to vector<16x256xf32>
    %23 = arith.mulf %21, %22 : vector<16x256xf32>
    %cst_15 = arith.constant dense<0.000000e+00> : vector<256xf32>
    %24 = vector.multi_reduction <add>, %23, %cst_15 [0] : vector<16x256xf32> to vector<256xf32>
    %25 = vector.shape_cast %24 : vector<256xf32> to vector<1x256xf32>
    %26 = vector.broadcast %5 : vector<1x1xf32> to vector<1x256xf32>
    %27 = arith.addf %25, %26 : vector<1x256xf32>
    %cst_16 = arith.constant 5.000000e-01 : f32
    %28 = vector.broadcast %cst_16 : f32 to vector<1x256xf32>
    %29 = arith.mulf %28, %27 : vector<1x256xf32>
    %30 = math.tanh %29 : vector<1x256xf32>
    %cst_17 = arith.constant 5.000000e-01 : f32
    %31 = vector.broadcast %cst_17 : f32 to vector<1x256xf32>
    %32 = arith.mulf %31, %30 : vector<1x256xf32>
    %cst_18 = arith.constant 5.000000e-01 : f32
    %33 = vector.broadcast %cst_18 : f32 to vector<1x256xf32>
    %34 = arith.addf %32, %33 : vector<1x256xf32>
    %c0_19 = arith.constant 0 : index
    %35 = arith.index_cast %7 : i32 to index
    %36 = vector.load %arg8[%c0_19, %35] : memref<1x256xf32, #tpu.memory_space<vmem>>, vector<1x256xf32>
    tpu.vector_store %arg8[%c0_19, %35], %34 {strides = array<i32>} : memref<1x256xf32, #tpu.memory_space<vmem>>, vector<1x256xf32>,
    %c1_i32 = arith.constant 1 : i32
    return
  }
  func.func @transform_0(%arg0: i32) -> (i32, i32) {
    %c0_i32 = arith.constant 0 : i32
    %c0_i32_0 = arith.constant 0 : i32
    return %arg0, %c0_i32 : i32, i32
  }
  func.func @transform_1(%arg0: i32) -> (i32, i32) {
    %c0_i32 = arith.constant 0 : i32
    %c0_i32_0 = arith.constant 0 : i32
    %c0_i32_1 = arith.constant 0 : i32
    return %c0_i32, %c0_i32_0 : i32, i32
  }
  func.func @transform_2(%arg0: i32) -> (i32, i32) {
    %c0_i32 = arith.constant 0 : i32
    %c0_i32_0 = arith.constant 0 : i32
    %c0_i32_1 = arith.constant 0 : i32
    return %c0_i32, %c0_i32_0 : i32, i32
  }
  func.func @transform_3(%arg0: i32) -> (i32, i32) {
    %c0_i32 = arith.constant 0 : i32
    %c0_i32_0 = arith.constant 0 : i32
    %c0_i32_1 = arith.constant 0 : i32
    return %c0_i32, %c0_i32_0 : i32, i32
  }
  func.func @transform_4(%arg0: i32) -> (i32, i32) {
    %c0_i32 = arith.constant 0 : i32
    %c0_i32_0 = arith.constant 0 : i32
    %c0_i32_1 = arith.constant 0 : i32
    return %c0_i32, %c0_i32_0 : i32, i32
  }
  func.func @transform_5(%arg0: i32) -> (i32, i32) {
    %c0_i32 = arith.constant 0 : i32
    %c0_i32_0 = arith.constant 0 : i32
    %c0_i32_1 = arith.constant 0 : i32
    return %c0_i32, %c0_i32_0 : i32, i32
  }
  func.func @transform_6(%arg0: i32) -> (i32, i32) {
    %c0_i32 = arith.constant 0 : i32
    %c0_i32_0 = arith.constant 0 : i32
    %c0_i32_1 = arith.constant 0 : i32
    return %c0_i32, %c0_i32_0 : i32, i32
  }
  func.func @transform_7(%arg0: i32) -> (i32, i32) {
    %c0_i32 = arith.constant 0 : i32
    %c0_i32_0 = arith.constant 0 : i32
    return %c0_i32, %arg0 : i32, i32
  }
}

</mosaic_0001>

<bundles_post_ra>
// kernel: tpu_custom_call.1
= control target key start
LH: loop header
LB: loop body
LE: loop exit
PB: predicated region body
PF: predicated region fallthrough
CT: control target
= control target key end

     0   :  { %s1149_s0 = inlined_call_operand.vmem [shape: f32[300,16], index: 0, kind: input, shape index: {}]   ;;  %s1150_s1 = inlined_call_operand.vmem [shape: bf16[32,16], index: 1, kind: input, shape index: {}]   ;;  %s1151_s2 = inlined_call_operand.vmem [shape: f32[32,1], index: 2, kind: input, shape index: {}]   ;;  %s1152_s3 = inlined_call_operand.vmem [shape: bf16[16,32], index: 3, kind: input, shape index: {}]   ;;  %s1153_s4 = inlined_call_operand.vmem [shape: f32[16,1], index: 4, kind: input, shape index: {}]   ;;  %s1154_s5 = inlined_call_operand.vmem [shape: f32[16,1], index: 5, kind: input, shape index: {}]   ;;  %s1155_s6 = inlined_call_operand.<no memory space> [shape: f32[1,1], index: 6, kind: input, shape index: {}]   ;;  %s1156_s7 = inlined_call_operand.hbm [shape: f32[1,300], index: 7, kind: output, shape index: {}]  }
   0x1   :  { %v12_v0 = vstv %s1155_s6 }
   0x2   :  { %13 = vst [vmem:[#allocation2] sm:$0x1] %v12_v0 }
   0x3   :  { %14 = vsyncpa [#allocation4], 0 }
   0x4   :  { %16 = vsyncpa [#allocation4 + $0x1], 0  ;;  %s943_s26 = smov 0   ;;  %s945_s27 = smov 0  }
   0x5   :  { %s947_s28 = smov 0   ;;  %s949_s29 = smov 0  }
   0x6 LB: > { %s964_s6 = sadd.s32 4294967295, %s895_s29   ;;  %s735_s30 = sadd.s32 4294967294, %s895_s29   ;;  %s895_s29 = sphi %s949_s29, %s1162_s29   ;;  %s891_s28 = sphi %s947_s28, %s1161_s28   ;;  %s887_s27 = sphi %s945_s27, %s1160_s27   ;;  %s883_s26 = sphi %s943_s26, %s1159_s26  }
   0x7   : > { %s968_s8 = sadd.s32 1, %s895_s29   ;;  %s181_s9 = sadd.s32 1, %s891_s28 }
   0x8   : > { %s178_s10 = ssub.s32 %s895_s29, %s968_s8  ;;  %p191_p0 = scmp.ne.s32.totalorder %s891_s28, %s887_s27 }
   0x9   : > { %p179_p1 = scmp.eq.s32.totalorder %s178_s10, 0  ;;  %p192_p2 = scmp.eq.s32.totalorder %s964_s6, 1 }
   0xa   : > { %p197_p3 = scmp.ne.s32.totalorder %s887_s27, %s883_s26  ;;  %p198_p4 = scmp.eq.s32.totalorder %s735_s30, 1 }
   0xb   : > { %s979_s11 = scalar_select %p179_p1, %s891_s28, %s181_s9  }
   0xc   : > { %p981_p5 = por %p192_p2, %p191_p0  ;;  %p985_p6 = por %p198_p4, %p197_p3 }
   0xd   : > { %p738_p7 = scmp.ge.s32.totalorder %s895_s29, 1  ;;  %p251_p8 = scmp.lt.s32.totalorder %s895_s29, 3 }
   0xf   : > { %p252_p9 = pnand %p738_p7, %p251_p8 }
  0x10   : > { %s992_s14 = sshll.u32 (!%p252_p9), %s964_s6, 5  ;;  %v998_v1 = vld [vmem:[%s1150_s1] sm:$0xff] (!%p252_p9)   ;;  %vm400_vm0 = vcmask (!%p252_p9), 130048   ;;  %v897_v3 = vmov (!%p252_p9), 0   ;;  %v313_v4 = vld [vmem:[%s1151_s2 + $0x10] sm:$0xff] (!%p252_p9)  ;;  %v312_v5 = vld [vmem:[%s1151_s2 + $0x8] sm:$0xff] (!%p252_p9) }
  0x11   : > { %255 = sbr.rel (%p252_p9) target bundleno = 617 (0x269), region = 48  ;;  %p292_p10 = scmp.lt.s32.totalorder (!%p252_p9), %s992_s14, 37  ;;  %v311_v2 = vld [vmem:[%s1151_s2] sm:$0xff] (!%p252_p9)  ;;  %772 = vmatprep.mubr.msk.bf16.mxu0 (!%p252_p9), %vm400_vm0, %v998_v1  ;;  %824 = vset.pattern.permute.xlu0 (!%p252_p9), %v897_v3  ;;  %v314_v6 = vld [vmem:[%s1151_s2 + $0x18] sm:$0xff] (!%p252_p9)  ;;  %v318_v19 = vld [vmem:[%s1153_s4 + $0x8] sm:$0xff] (!%p252_p9)  ;;  %vm535_vm1 = vcmask (!%p252_p9), 261120  }
  0x12   : > { %372 = vperm.xlu0 (!%p252_p9), %824, %v311_v2   ;;  %825 = vset.pattern.permute.xlu1 (!%p252_p9), %v897_v3  ;;  %v317_v16 = vld [vmem:[%s1153_s4] sm:$0xff] (!%p252_p9)  ;;  %v320_v25 = vld [vmem:[%s1154_s5 + $0x8] sm:$0xff] (!%p252_p9)  ;;  %s284_s10 = sand.u32 (!%p252_p9), 1, %s887_s27  }
  0x13   : > { %382 = vperm.xlu1 (!%p252_p9), %825, %v313_v4   ;;  %571 = vmatprep.mubr.bf16.mxu1 (!%p252_p9), %v897_v3  ;;  %v319_v22 = vld [vmem:[%s1154_s5] sm:$0xff] (!%p252_p9)  ;;  %s739_s15 = sshll.u32 (!%p252_p9), %s284_s10, 1  ;;  %s1095_s17 = scalar_lea.sflag (!%p252_p9), [#allocation4], %s284_s10 }
  0x14   : > { %v321_v28 = vld [vmem:[#allocation2] sm:$0x1] (!%p252_p9)  ;;  %s286_s16 = scalar_lea.vmem (!%p252_p9), [#allocation3], %s739_s15 }
  0x16   : > { %377 = vperm.xlu0 (!%p252_p9), %824, %v312_v5   ;;  %v827_v5 = vld [vmem:[%s1150_s1 + $0x8] sm:$0xff] (!%p252_p9)  }
  0x17   : > { %387 = vperm.xlu1 (!%p252_p9), %825, %v314_v6  }
  0x18   : > { %s293_s19 = scalar_select %p292_p10, %s992_s14, 37 }
  0x19   : > { %s749_s18 = sshll.u32 (%p981_p5), %s964_s6, 1 }
  0x1a   : > { %s741_s22 = sshll.u32 %s293_s19, 3  ;;  %522 = vperm.xlu0 %824, %v317_v16   ;;  %s665_s19 = ssub.s32 (%p981_p5), 3, %s749_s18 }
  0x1b   : > { %s1015_s9 = scalar_lea.vmem %s1149_s0, %s741_s22  ;;  %527 = vperm.xlu1 %825, %v318_v19   ;;  %p666_p11 = scmp.lt.s32.totalorder (%p981_p5), %s665_s19, 2 }
  0x1c   : > { %v338_v7 = vld [vmem:[%s1015_s9 + $0x80] sm:$0xff]  ;;  %v339_v8 = vld [vmem:[%s1015_s9 + $0x88] sm:$0xff]  ;;  %v340_v12 = vld [vmem:[%s1015_s9 + $0x90] sm:$0xff] }
  0x1d   : > { %v322_v9 = vld [vmem:[%s1015_s9] sm:$0xff]  ;;  %v362_v10 = vpack.c.bf16 %v339_v8, %v338_v7  ;;  %v323_v11 = vld [vmem:[%s1015_s9 + $0x8] sm:$0xff]  ;;  %v341_v13 = vld [vmem:[%s1015_s9 + $0x98] sm:$0xff] }
  0x1e   : > { %v354_v14 = vpack.c.bf16 %v323_v11, %v322_v9  ;;  %v363_v15 = vpack.c.bf16 %v341_v13, %v340_v12  ;;  %v324_v17 = vld [vmem:[%s1015_s9 + $0x10] sm:$0xff]  ;;  %v325_v18 = vld [vmem:[%s1015_s9 + $0x18] sm:$0xff]  ;;  %v342_v23 = vld [vmem:[%s1015_s9 + $0xa0] sm:$0xff]  ;;  %588 = vperm.xlu0 %824, %v319_v22  }
  0x1f   : > { %776 = vmatprep.subr.msk.bf16.mxu0 %vm400_vm0, %v362_v10  ;;  %v355_v21 = vpack.c.bf16 %v325_v18, %v324_v17  ;;  %v343_v24 = vld [vmem:[%s1015_s9 + $0xa8] sm:$0xff]  ;;  %593 = vperm.xlu1 %825, %v320_v25   ;;  %v326_v29 = vld [vmem:[%s1015_s9 + $0x20] sm:$0xff]  ;;  %v344_v32 = vld [vmem:[%s1015_s9 + $0xb0] sm:$0xff] }
  0x20   : > { %v408_v20 = vsel %vm400_vm0, %v354_v14, 0  ;;  %v364_v27 = vpack.c.bf16 %v343_v24, %v342_v23  ;;  %v327_v30 = vld [vmem:[%s1015_s9 + $0x28] sm:$0xff]  ;;  %v345_v33 = vld [vmem:[%s1015_s9 + $0xb8] sm:$0xff]  ;;  %v328_v36 = vld [vmem:[%s1015_s9 + $0x30] sm:$0xff] }
  0x21   : > { %757 = vmatpush3.bf16.xpose.msra.mxu0 %v408_v20  ;;  %v411_v26 = vsel %vm400_vm0, %v355_v21, 0  ;;  %v356_v31 = vpack.c.bf16 %v327_v30, %v326_v29  ;;  %v365_v35 = vpack.c.bf16 %v345_v33, %v344_v32  ;;  %v329_v37 = vld [vmem:[%s1015_s9 + $0x38] sm:$0xff]  ;;  %v346_v39 = vld [vmem:[%s1015_s9 + $0xc0] sm:$0xff]  ;;  %v347_v40 = vld [vmem:[%s1015_s9 + $0xc8] sm:$0xff] }
  0x22   : > { %777 = vmatprep.subr.msk.bf16.mxu0 %vm400_vm0, %v363_v15  ;;  %616 = vperm.xlu0 %824, %v321_v28   ;;  %v357_v38 = vpack.c.bf16 %v329_v37, %v328_v36  ;;  %v366_v42 = vpack.c.bf16 %v347_v40, %v346_v39  ;;  %v330_v43 = vld [vmem:[%s1015_s9 + $0x40] sm:$0xff]  ;;  %v331_v44 = vld [vmem:[%s1015_s9 + $0x48] sm:$0xff]  ;;  %v348_v46 = vld [vmem:[%s1015_s9 + $0xd0] sm:$0xff] }
  0x23   : > { %v414_v34 = vsel %vm400_vm0, %v356_v31, 0  ;;  %v358_v45 = vpack.c.bf16 %v331_v44, %v330_v43  ;;  %v349_v47 = vld [vmem:[%s1015_s9 + $0xd8] sm:$0xff]  ;;  %v332_v50 = vld [vmem:[%s1015_s9 + $0x50] sm:$0xff]  ;;  %v350_v53 = vld [vmem:[%s1015_s9 + $0xe0] sm:$0xff] }
  0x24   : > { %v417_v41 = vsel %vm400_vm0, %v357_v38, 0  ;;  %v367_v49 = vpack.c.bf16 %v349_v47, %v348_v46  ;;  %v333_v51 = vld [vmem:[%s1015_s9 + $0x58] sm:$0xff]  ;;  %v351_v54 = vld [vmem:[%s1015_s9 + $0xe8] sm:$0xff]  ;;  %v334_v57 = vld [vmem:[%s1015_s9 + $0x60] sm:$0xff] }
  0x25   : > { %v420_v48 = vsel %vm400_vm0, %v358_v45, 0  ;;  %v359_v52 = vpack.c.bf16 %v333_v51, %v332_v50  ;;  %v368_v56 = vpack.c.bf16 %v351_v54, %v350_v53  ;;  %v335_v58 = vld [vmem:[%s1015_s9 + $0x68] sm:$0xff]  ;;  %v352_v60 = vld [vmem:[%s1015_s9 + $0xf0] sm:$0xff]  ;;  %v353_v61 = vld [vmem:[%s1015_s9 + $0xf8] sm:$0xff] }
  0x26   : > { %v360_v59 = vpack.c.bf16 %v335_v58, %v334_v57  ;;  %v369_v63 = vpack.c.bf16 %v353_v61, %v352_v60  ;;  %v336_v0 = vld [vmem:[%s1015_s9 + $0x70] sm:$0xff]  ;;  %v337_v2 = vld [vmem:[%s1015_s9 + $0x78] sm:$0xff]  ;;  %v828_v37 = vld [vmem:[%s1152_s3] sm:$0xff]   ;;  %v619_v58 = vlaneseq }
  0x27   : > { %v423_v55 = vsel %vm400_vm0, %v359_v52, 0  ;;  %v361_v3 = vpack.c.bf16 %v337_v2, %v336_v0 }
  0x28   : > { %v426_v62 = vsel %vm400_vm0, %v360_v59, 0  ;;  %vm653_vm2 = vcmp.lt.s32.totalorder %v619_v58, 256 }
  0x29   : > { %759 = vmatpush3.bf16.xpose.msra.mxu0 %v411_v26  ;;  %v429_v4 = vsel %vm400_vm0, %v361_v3, 0 }
  0x2a   : > { %778 = vmatprep.subr.msk.bf16.mxu0 %vm400_vm0, %v364_v27 }
  0x31   : > { %761 = vmatpush3.bf16.xpose.msra.mxu0 %v414_v34 }
  0x32   : > { %779 = vmatprep.subr.msk.bf16.mxu0 %vm400_vm0, %v365_v35 }
  0x39   : > { %763 = vmatpush3.bf16.xpose.msra.mxu0 %v417_v41 }
  0x3a   : > { %780 = vmatprep.subr.msk.bf16.mxu0 %vm400_vm0, %v366_v42 }
  0x41   : > { %765 = vmatpush3.bf16.xpose.msra.mxu0 %v420_v48 }
  0x42   : > { %781 = vmatprep.subr.msk.bf16.mxu0 %vm400_vm0, %v367_v49 }
  0x49   : > { %767 = vmatpush3.bf16.xpose.msra.mxu0 %v423_v55 }
  0x4a   : > { %782 = vmatprep.subr.msk.bf16.mxu0 %vm400_vm0, %v368_v56 }
  0x51   : > { %769 = vmatpush3.bf16.xpose.msra.mxu0 %v426_v62 }
  0x52   : > { %783 = vmatprep.subr.msk.bf16.mxu0 %vm400_vm0, %v369_v63  ;;  %v620_v63 = vshrl.u32 %v619_v58, 7 }
  0x59   : > { %771 = vmatpush3.bf16.xpose.msra.mxu0 %v429_v4 }
  0x60   : > { %773 = vmatmul.mubr.msk.bf16.vlgmr.msra.gmra.mrb[0].mxu0 %vm400_vm0, %v998_v1 }
  0x61   : > { %774 = vmatprep.mubr.msk.bf16.mxu0 %vm400_vm0, %v827_v5 }
  0x68   : > { %775 = vmatmul.mubr.msk.bf16.gmra.mrb[4].mxu0 %vm400_vm0, %v827_v5  ;;  %v621_v5 = vsub.s32 0, %v620_v63 }
  0x91   : > { %v373_v6 = vpop.permute.xlu0 %372 }
  0x92   : > { %v383_v15 = vpop.permute.xlu1 %382 }
  0x95   : > { %v378_v10 = vpop.permute.xlu0 %377 }
  0x96   : > { %v388_v25 = vpop.permute.xlu1 %387 }
  0x99   : > { %v523_v38 = vpop.permute.xlu0 %522 }
  0x9a   : > { %v528_v39 = vpop.permute.xlu1 %527 }
  0x9d   : > { %v589_v51 = vpop.permute.xlu0 %588 }
  0x9e   : > { %v594_v52 = vpop.permute.xlu1 %593 }
 0x133   : > { %v489_v7 = vpop.f32.mrb[0].mxu0 }
 0x134   : > { %v490_v8 = vadd.f32 %v489_v7, %v373_v6  ;;  %v491_v9 = vpop.f32.mrb[1].mxu0  ;;  %v617_v7 = vpop.permute.xlu0 %616 }
 0x135   : > { %v492_v11 = vadd.f32 %v491_v9, %v373_v6  ;;  %v493_v12 = vpop.f32.mrb[2].mxu0 }
 0x136   : > { %v494_v13 = vadd.f32 %v493_v12, %v378_v10  ;;  %v495_v14 = vpop.f32.mrb[3].mxu0  ;;  %v508_v17 = vmax.f32 %v490_v8, 0.0 }
 0x137   : > { %v496_v16 = vadd.f32 %v495_v14, %v378_v10  ;;  %v509_v19 = vmax.f32 %v492_v11, 0.0  ;;  %v622_v11 = vrot.slane %v617_v7, %v621_v5 }
 0x138   : > { %v510_v18 = vmax.f32 %v494_v13, 0.0 }
 0x139   : > { %v511_v20 = vmax.f32 %v496_v16, 0.0 }
 0x13a   : > { %v516_v1 = vpack.c.bf16 %v510_v18, %v508_v17  ;;  %v898_v18 = vmov 1966171168  }
 0x13b   : > { %v499_v21 = vpop.f32.mrb[4].mxu0  ;;  %v517_v22 = vpack.c.bf16 %v511_v20, %v509_v19  ;;  %v637_v19 = vunpack.c.l.s4 %v898_v18 }
 0x13c   : > { %v500_v23 = vadd.f32 %v499_v21, %v383_v15  ;;  %v501_v24 = vpop.f32.mrb[5].mxu0 }
 0x13d   : > { %v502_v26 = vadd.f32 %v501_v24, %v383_v15  ;;  %v503_v27 = vpop.f32.mrb[6].mxu0  ;;  %539 = vmatprep.subr.bf16.mxu1 %v517_v22 }
 0x13e   : > { %v504_v28 = vadd.f32 %v503_v27, %v388_v25  ;;  %v505_v29 = vpop.f32.mrb[7].mxu0  ;;  %540 = vmatpush1.bf16.msra.mxu1 %v516_v1  ;;  %v512_v31 = vmax.f32 %v500_v23, 0.0  ;;  %v638_v1 = vunpack.c.0.s8 %v637_v19 }
 0x13f   : > { %v506_v30 = vadd.f32 %v505_v29, %v388_v25  ;;  %v513_v33 = vmax.f32 %v502_v26, 0.0 }
 0x140   : > { %v514_v32 = vmax.f32 %v504_v28, 0.0  ;;  %v641_v25 = vsub.s32 %v638_v1, %v620_v63 }
 0x141   : > { %v515_v34 = vmax.f32 %v506_v30, 0.0 }
 0x142   : > { %v518_v35 = vpack.c.bf16 %v514_v32, %v512_v31 }
 0x143   : > { %v519_v36 = vpack.c.bf16 %v515_v34, %v513_v33 }
 0x145   : > { %541 = vmatprep.subr.bf16.mxu1 %v519_v36 }
 0x146   : > { %542 = vmatpush1.bf16.msra.mxu1 %v518_v35 }
 0x149   : > { %747 = vmatmul.mubr.msk.bf16.vlgmr.msra.gmra.mrb[0].mxu1 %vm535_vm1, %v828_v37 }
 0x21c   : > { %v573_v40 = vpop.f32.mrb[0].mxu1 }
 0x21d   : > { %v574_v41 = vadd.f32 %v573_v40, %v523_v38  ;;  %v575_v42 = vpop.f32.mrb[1].mxu1 }
 0x21e   : > { %v576_v43 = vadd.f32 %v575_v42, %v523_v38  ;;  %v577_v44 = vpop.f32.mrb[2].mxu1 }
 0x21f   : > { %v582_v45 = vmax.f32 %v574_v41, 0.0  ;;  %v578_v46 = vadd.f32 %v577_v44, %v528_v39  ;;  %v579_v47 = vpop.f32.mrb[3].mxu1 }
 0x220   : > { %v583_v48 = vmax.f32 %v576_v43, 0.0  ;;  %v580_v49 = vadd.f32 %v579_v47, %v528_v39 }
 0x221   : > { %v584_v50 = vmax.f32 %v578_v46, 0.0  ;;  %v596_v54 = vmul.f32 %v589_v51, %v582_v45 }
 0x222   : > { %v585_v53 = vmax.f32 %v580_v49, 0.0  ;;  %v597_v56 = vmul.f32 %v589_v51, %v583_v48 }
 0x223   : > { %v598_v55 = vmul.f32 %v594_v52, %v584_v50 }
 0x224   : > { %v599_v57 = vmul.f32 %v594_v52, %v585_v53 }
 0x225   : > { %v600_v59 = vadd.f32 %v598_v55, %v596_v54 }
 0x226   : > { %v607_v60 = vadd.f32 %v599_v57, %v597_v56 }
 0x227   : > { %v601_v61 = vrot.slane %v600_v59, 4 }
 0x228   : > { %v608_v62 = vrot.slane %v607_v60, 4 }
 0x229   : > { %v602_v0 = vadd.f32 %v601_v61, %v600_v59 }
 0x22a   : > { %v609_v2 = vadd.f32 %v608_v62, %v607_v60 }
 0x22b   : > { %v603_v3 = vrot.slane %v602_v0, 2 }
 0x22c   : > { %v610_v4 = vrot.slane %v609_v2, 2 }
 0x22d   : > { %v604_v6 = vadd.f32 %v603_v3, %v602_v0 }
 0x22e   : > { %v611_v8 = vadd.f32 %v610_v4, %v609_v2 }
 0x22f   : > { %v605_v9 = vrot.slane %v604_v6, 1 }
 0x230   : > { %v612_v10 = vrot.slane %v611_v8, 1 }
 0x231   : > { %v606_v12 = vadd.f32 %v605_v9, %v604_v6 }
 0x232   : > { %v613_v13 = vadd.f32 %v612_v10, %v611_v8 }
 0x233   : > { %v623_v14 = vadd.f32 %v622_v11, %v606_v12 }
 0x234   : > { %v624_v15 = vadd.f32 %v622_v11, %v613_v13 }
 0x235   : > { %v625_v16 = vmul.f32 0.5, %v623_v14 }
 0x236   : > { %v626_v17 = vmul.f32 0.5, %v624_v15 }
 0x237   : > { %829 = vtanh.f32 %v625_v16 }
 0x238   : > { %831 = vtanh.f32 %v626_v17 }
 0x241   : > { %v830_v20 = vpop.eup %829 }
 0x242   : > { %v832_v21 = vpop.eup %831  ;;  %v629_v22 = vmul.f32 0.5, %v830_v20 }
 0x243   : > { %v630_v23 = vmul.f32 0.5, %v832_v21 }
 0x244   : > { %v631_v24 = vadd.f32 0.5, %v629_v22 }
 0x245   : > { %v632_v26 = vadd.f32 0.5, %v630_v23 }
 0x247   : > { %v635_v27 = vcombine.low %v631_v24, %v632_v26  ;;  %663 = sbr.rel (!%p981_p5) target bundleno = 617 (0x269), region = 52 }
 0x249   : > { %v642_v28 = vrot.slane %v635_v27, %v641_v25 }
 0x24b   : > { %v649_v29 = vrot.slane %v642_v28, %v641_v25 }
 0x24d   : > { %655 = vst.msk [vmem:[%s286_s16] sm:$0x3] %vm653_vm2, %v649_v29 }
 0x24e   : > { %s1164_s19 = smov (!%p666_p11, %s665_s19), 2 }
 0x24f   : > { %s1100_s20 = sshll.u32 %s1164_s19, 4 }
 0x250   : > { %s670_s21 = ssub.s32 32, %s1100_s20 }
 0x251   : > { %671 = vsyncadd %s1095_s17, %s670_s21  ;;  %p751_p12 = scmp.ne.s32.totalorder %s1100_s20, 0  ;;  %s1109_s12 = scalar_lea.hbm %s1156_s7, %s992_s14 }
 0x252   : > { %s676_s24 = sshll.u32 %s286_s16, 4  ;;  %s899_s25 = smov [#allocation3]   ;;  %s677_s24 = int_to_ptr.vmem [resolvable:$true] %s676_s24 }
 0x253   : > { %s833_s6 = scalar_lea.vmem %s677_s24, %s1100_s20  ;;  %s837_s30 = sshll.u32 %s899_s25, 4  ;;  %s838_s30 = int_to_ptr.vmem [resolvable:$false] %s837_s30 }
 0x254   : > { %p834_p13 = scmp.ne.s32.totalorder %s677_s24, %s833_s6  ;;  %s839_s9 = scalar_lea.vmem %s838_s30, 64 }
 0x255   : > { %p840_p2 = scmp.lt.s32.totalorder %s677_s24, %s838_s30  ;;  %p841_p3 = scmp.lt.s32.totalorder %s839_s9, %s833_s6 }
 0x256   : > { %p835_p0 = pnand %p834_p13, %p751_p12 }
 0x257   : > { %p842_p4 = por %p841_p3, %p840_p2 }
 0x258   : > { %p836_p1 = pneg %p835_p0 }
 0x25a   : > { %p843_p5 = pnand %p842_p4, %p836_p1 }
 0x25c   : > { %846 = shalt.err (!%p843_p5)
}
 0x25d   : > { %s847_s14 = scalar_lea.hbm %s1109_s12, %s1100_s20  ;;  %s851_s16 = scalar_lea.hbm %s1156_s7, 48 }
 0x25e   : > { %p848_p7 = scmp.ne.s32.totalorder %s1109_s12, %s847_s14  ;;  %p852_p10 = scmp.lt.u32.totalorder %s1109_s12, %s1156_s7 }
 0x25f   : > { %p853_p11 = scmp.lt.u32.totalorder %s851_s16, %s847_s14  ;;  %p855_p0 = scmp.lt.u32.totalorder %s847_s14, %s1109_s12 }
 0x260   : > { %p849_p8 = pnand %p848_p7, %p751_p12 }
 0x261   : > { %p854_p13 = por %p853_p11, %p852_p10 }
 0x262   : > { %p850_p9 = pneg %p849_p8 }
 0x263   : > { %p856_p1 = por %p855_p0, %p854_p13 }
 0x265   : > { %p857_p2 = pnand %p856_p1, %p850_p9 }
 0x267   : > { %860 = shalt.err (!%p857_p2)
}
 0x268   : > { %679 = dma.vmem_to_hbm [thread:$0]  (%p751_p12), %s677_s24, %s1100_s20, %s1109_s12, %s1095_s17  }
 0x269 PF: > { %p789_p3 = scmp.ge.s32.totalorder %s895_s29, 2  ;;  %s688_s21 = sand.u32 1, %s883_s26  }
 0x26a   : > { %s689_s22 = scalar_lea.sflag [#allocation4], %s688_s21 }
 0x26b   : > { %p786_p4 = pnand %p789_p3, %p985_p6 }
 0x26d   : > { %878 = dma.done.wait (!%p786_p4), %s689_s22, 32  }
 0x26e   : > { %880 = vsyncadd (!%p786_p4), %s689_s22, 4294967264  ;;  %p19_p5 = scmp.ge.s32.totalorder %s968_s8, 4   ;;  %s1159_s26 = smov %s887_s27 }
 0x26f   : > { %s1160_s27 = smov %s891_s28  ;;  %s1161_s28 = smov %s979_s11 }
 0x270   : > { %s1162_s29 = smov %s968_s8  ;;  %21 = sbr.rel (!%p19_p5) target bundleno = 6 (0x6), region = 83 }
 0x277   :  { %694 = vsyncpa [#allocation4], 1 }
 0x278   :  { %696 = vsyncpa [#allocation4 + $0x1], 1 }

</bundles_post_ra>
